<compile_context>
chip_gen: v6e
topology: v6e:2x2x1
jax: 0.10.0
libtpu: 0.0.40
codegen_flags: <defaults>
</compile_context>

<pallas_src>
import jax
import jax.numpy as jnp
from jax.experimental import pallas as pl
from jax.experimental.pallas import tpu as pltpu

_MIB = 1024 * 1024


def _dis_one_linear_kernel(x_ref, w_ref, b_ref, o_ref):
    # x_ref: (tm, dim) VMEM (streamed)   w_ref: (dim, 1) VMEM (resident, x dtype)
    # b_ref: (1,)      SMEM scalar       o_ref: (tm, 1) VMEM
    acc = jnp.dot(x_ref[...], w_ref[...],
                  preferred_element_type=jnp.float32)     # MXU, f32 accumulation
    o_ref[...] = jax.nn.sigmoid(acc + b_ref[0]).astype(o_ref.dtype)


def _round_up(v, m):
    return ((v + m - 1) // m) * m


def _vmem_budget_bytes():
    """Generation-aware scoped-VMEM budget: ~96 MiB on 128 MiB chips
    (v5e/v6e), ~48 MiB on 64 MiB-per-TC chips (v7x)."""
    try:
        cap = int(pltpu.get_tpu_info().vmem_capacity_bytes)
    except Exception:  # interpret mode / older runtime: assume the small case
        cap = 64 * _MIB
    return 96 * _MIB if cap >= 96 * _MIB else 48 * _MIB


def _choose_tm(m, dim, dtype_bytes, vmem_budget):
    """Largest batch tile fitting a double-buffered x stream plus the
    lane-padded (tm, 1) output block in the VMEM budget; trimmed only so large
    batches get ~2-4 pipeline steps (tiles never below 512 rows), with the
    step count nudged to be even for v7x's two TensorCores."""
    # Resident weight column (dim, 1) occupies ~dim*128*bytes in VMEM (x2 bufs).
    w_tile = 2 * _round_up(max(dim, 8), 8) * 128 * dtype_bytes
    headroom = 8 * _MIB + w_tile
    per_buf = max((vmem_budget - headroom) // 2, 4 * _MIB)
    # Per-row VMEM: dim elements of x + 128 lane-padded output elements.
    row_bytes = (dim + 128) * dtype_bytes
    tm = max(per_buf // row_bytes, 8)
    if tm >= 128:
        tm = min((tm // 128) * 128, 16384)
    else:
        tm = max(8, (tm // 8) * 8)        # enormous-dim fallback

    # Give large batches a few pipeline steps (and both v7x cores work), but
    # never shrink tiles into the ~0.35 us/step overhead-dominated regime.
    if m >= 1024:
        for target_steps in (4, 2):
            tm_target = _round_up(pl.cdiv(m, target_steps), 128)
            if tm_target >= 512:
                tm = min(tm, tm_target)
                break

    if tm >= m:
        return m                          # single full-batch tile

    # Nudge to an even step count so v7x's two TensorCores stay balanced.
    steps = pl.cdiv(m, tm)
    if steps > 1 and steps % 2 == 1:
        m_blocks = pl.cdiv(m, 128)
        for target in (steps + 1, steps + 3):
            cand = max(128, pl.cdiv(m_blocks, target) * 128)
            if pl.cdiv(m, cand) % 2 == 0:
                tm = cand
                break
    return tm


def dis_one_linear(x, w, b, *, tm=None, vmem_limit_bytes=None):
    """y = sigmoid(x @ w + b); x: (M, dim); w: (dim, 1), (1, dim) or (dim,);
    b: any 1-element array. Output dtype follows x.dtype."""
    M, dim = x.shape
    assert w.size == dim, "weight must have `dim` elements"

    w_col = jnp.reshape(w, (dim, 1)).astype(x.dtype)      # MXU weight column
    b_s = jnp.reshape(b, (-1,))[:1].astype(jnp.float32)   # (1,) scalar bias (SMEM)

    dt_bytes = jnp.dtype(x.dtype).itemsize
    budget = _vmem_budget_bytes()
    if tm is None:
        tm = _choose_tm(M, dim, dt_bytes, budget)

    steps = pl.cdiv(M, tm)   # ragged last block handled by Pallas (no jnp.pad)

    if vmem_limit_bytes is None:
        w_tile = _round_up(max(dim, 8), 8) * 128 * dt_bytes
        need = 2 * tm * (dim + 128) * dt_bytes + 2 * w_tile + 8 * _MIB
        vmem_limit_bytes = int(min(max(need, 16 * _MIB), budget))

    grid_spec = pltpu.PrefetchScalarGridSpec(
        num_scalar_prefetch=0,
        grid=(steps,),
        in_specs=[
            pl.BlockSpec((tm, dim), lambda i: (i, 0)),            # streamed x tile
            pl.BlockSpec((dim, 1), lambda i: (0, 0)),             # weight column, resident
            pl.BlockSpec(memory_space=pltpu.MemorySpace.SMEM),    # scalar bias in SMEM
        ],
        out_specs=pl.BlockSpec((tm, 1), lambda i: (i, 0)),
    )

    return pl.pallas_call(
        _dis_one_linear_kernel,
        out_shape=jax.ShapeDtypeStruct((M, 1), x.dtype),
        grid_spec=grid_spec,
        compiler_params=pltpu.CompilerParams(
            dimension_semantics=("parallel",),
            vmem_limit_bytes=int(vmem_limit_bytes),
        ),
    )(x, w_col, b_s)


def reference(x, w, b):
    return jax.nn.sigmoid(
        jnp.dot(x, jnp.reshape(w, (x.shape[1], 1)),
                precision=jax.lax.Precision.HIGHEST,
                preferred_element_type=jnp.float32)
        + jnp.reshape(b, (-1,))[:1])


if __name__ == "__main__":
    key = jax.random.PRNGKey(0)
    kx, kw, kb, kx2, kw2, kb2 = jax.random.split(key, 6)

    # Small shapes consistent with the module: batch=16, dim=32.
    batch, dim = 16, 32
    x = jax.random.normal(kx, (batch, dim), dtype=jnp.float32)
    bound = 1.0 / jnp.sqrt(jnp.float32(dim))
    w = jax.random.uniform(kw, (dim, 1), minval=-bound, maxval=bound,
                           dtype=jnp.float32)
    b = jax.random.uniform(kb, (1,), minval=-bound, maxval=bound,
                           dtype=jnp.float32)

    y = jax.block_until_ready(dis_one_linear(x, w, b))
    y_ref = reference(x, w, b)
    assert y.shape == (batch, 1)
    assert jnp.allclose(y, y_ref, atol=2e-3, rtol=2e-3), \
        float(jnp.max(jnp.abs(y - y_ref)))

    # Ragged-tail check: M not divisible by the forced tile -> multi-step grid
    # with a partial last block (validates masked stores without wrapper pad).
    m2, d2 = 300, 128
    x2 = jax.random.normal(kx2, (m2, d2), dtype=jnp.float32)
    bound2 = 1.0 / jnp.sqrt(jnp.float32(d2))
    w2 = jax.random.uniform(kw2, (d2, 1), minval=-bound2, maxval=bound2,
                            dtype=jnp.float32)
    b2 = jax.random.uniform(kb2, (1,), minval=-bound2, maxval=bound2,
                            dtype=jnp.float32)
    y2 = jax.block_until_ready(dis_one_linear(x2, w2, b2, tm=128))
    y2_ref = reference(x2, w2, b2)
    assert y2.shape == (m2, 1)
    assert jnp.allclose(y2, y2_ref, atol=2e-3, rtol=2e-3), \
        float(jnp.max(jnp.abs(y2 - y2_ref)))

    print("KERNEL_OK")
</pallas_src>

<mosaic_0001>
module attributes {stable_mosaic.version = 11 : i64} {
  func.func @_dis_one_linear_kernel(%arg0: i32, %arg1: memref<16x32xf32, #tpu.memory_space<vmem>>, %arg2: memref<32x1xf32, #tpu.memory_space<vmem>>, %arg3: memref<1xf32, #tpu.memory_space<smem>>, %arg4: memref<16x1xf32, #tpu.memory_space<vmem>>) attributes {dimension_semantics = [#tpu.dimension_semantics<parallel>], iteration_bounds = array<i64: 1>, scalar_prefetch = 0 : i64, scratch_operands = 0 : i64, tpu.core_type = #tpu.core_type<tc>, window_params = [{transform_indices = @transform_0, window_bounds = array<i64: 16, 32>}, {pipeline_mode = #tpu.pipeline_mode<synchronous>, transform_indices = @transform_1, window_bounds = array<i64: 32, 1>}, {transform_indices = @transform_2, window_bounds = array<i64: 1>}, {transform_indices = @transform_3, window_bounds = array<i64: 16, 1>}]} {
    %c0 = arith.constant 0 : index
    %c0_0 = arith.constant 0 : index
    %0 = vector.load %arg1[%c0, %c0_0] : memref<16x32xf32, #tpu.memory_space<vmem>>, vector<16x32xf32>
    %c0_1 = arith.constant 0 : index
    %c0_2 = arith.constant 0 : index
    %1 = vector.load %arg2[%c0_1, %c0_2] : memref<32x1xf32, #tpu.memory_space<vmem>>, vector<32x1xf32>
    %cst = arith.constant dense<0.000000e+00> : vector<16x1xf32>
    %2 = tpu.matmul %0, %1, %cst {dimension_numbers = #tpu.dot_dimension_numbers<[1], [0], [0], [1], [0, 0, 1, 1], [], []>} : vector<16x32xf32>, vector<32x1xf32>, vector<16x1xf32> -> vector<16x1xf32>
    %c0_3 = arith.constant 0 : index
    %3 = memref.load %arg3[%c0_3] : memref<1xf32, #tpu.memory_space<smem>>
    %4 = vector.broadcast %3 : f32 to vector<16x1xf32>
    %5 = arith.addf %2, %4 : vector<16x1xf32>
    %6 = arith.negf %5 : vector<16x1xf32>
    %7 = math.exp %6 : vector<16x1xf32>
    %cst_4 = arith.constant 1.000000e+00 : f32
    %8 = vector.broadcast %cst_4 : f32 to vector<16x1xf32>
    %9 = arith.addf %8, %7 : vector<16x1xf32>
    %10 = arith.divf %8, %9 : vector<16x1xf32>
    %c0_5 = arith.constant 0 : index
    %c0_6 = arith.constant 0 : index
    %11 = vector.load %arg4[%c0_5, %c0_6] : memref<16x1xf32, #tpu.memory_space<vmem>>, vector<16x1xf32>
    tpu.vector_store %arg4[%c0_5, %c0_6], %10 {strides = array<i32>} : memref<16x1xf32, #tpu.memory_space<vmem>>, vector<16x1xf32>,
    return
  }
  func.func @transform_0(%arg0: i32) -> (i32, i32) {
    %c0_i32 = arith.constant 0 : i32
    %c0_i32_0 = arith.constant 0 : i32
    return %arg0, %c0_i32 : i32, i32
  }
  func.func @transform_1(%arg0: i32) -> (i32, i32) {
    %c0_i32 = arith.constant 0 : i32
    %c0_i32_0 = arith.constant 0 : i32
    %c0_i32_1 = arith.constant 0 : i32
    return %c0_i32, %c0_i32_0 : i32, i32
  }
  func.func @transform_2(%arg0: i32) -> i32 {
    %c0_i32 = arith.constant 0 : i32
    %c0_i32_0 = arith.constant 0 : i32
    return %c0_i32 : i32
  }
  func.func @transform_3(%arg0: i32) -> (i32, i32) {
    %c0_i32 = arith.constant 0 : i32
    %c0_i32_0 = arith.constant 0 : i32
    return %arg0, %c0_i32 : i32, i32
  }
}

</mosaic_0001>

<bundles_post_ra>
// kernel: tpu_custom_call.1
= control target key start
LH: loop header
LB: loop body
LE: loop exit
PB: predicated region body
PF: predicated region fallthrough
CT: control target
= control target key end

     0   :  { %vm23_vm0 = vcmask 261120   ;;  %vm117_vm1 = vcmask 7168   ;;  %s202_s1 = inlined_call_operand.vmem [shape: f32[32,1], index: 1, kind: input, shape index: {}]   ;;  %s203_s0 = inlined_call_operand.vmem [shape: f32[16,32], index: 0, kind: input, shape index: {}]   ;;  %s204_s2 = inlined_call_operand.<no memory space> [shape: f32[1], index: 2, kind: input, shape index: {}]   ;;  %s205_s3 = inlined_call_operand.vmem [shape: f32[16,1], index: 3, kind: output, shape index: {}]  }
   0x1   :  { %v20_v0 = vld [vmem:[%s202_s1 + $0x18] sm:$0xff]  ;;  %v19_v1 = vld [vmem:[%s202_s1 + $0x10] sm:$0xff]  ;;  %v15_v2 = vld [vmem:[%s203_s0] sm:$0xff]  ;;  %v22_v6 = vstv %s204_s2 }
   0x2   :  { %134 = vmatprep.subr.mxu0 %v20_v0  ;;  %v18_v3 = vld [vmem:[%s202_s1 + $0x8] sm:$0xff]  ;;  %142 = vmatprep.mubr.msk.f32.mxu0 %vm23_vm0, %v15_v2  ;;  %v17_v4 = vld [vmem:[%s202_s1] sm:$0xff] }
   0x3   :  { %135 = vmatpush3.msra.mxu0 %v20_v0  ;;  %v16_v5 = vld [vmem:[%s203_s0 + $0x8] sm:$0xff] }
   0x4   :  { %136 = vmatprep.subr.mxu0 %v19_v1 }
   0x5   :  { %137 = vmatpush3.msra.mxu0 %v19_v1 }
   0x6   :  { %138 = vmatprep.subr.mxu0 %v18_v3 }
   0x7   :  { %139 = vmatpush3.msra.mxu0 %v18_v3 }
   0x8   :  { %140 = vmatprep.subr.mxu0 %v17_v4 }
   0x9   :  { %141 = vmatpush3.msra.mxu0 %v17_v4 }
   0xa   :  { %143 = vmatmul.mubr.msk.f32.vlgmr.msra.gmra.mxu0 %vm23_vm0, %v16_v5 }
  0xca   :  { %v144_v7 = vpop.f32.mrf.mxu0 }
  0xcb   :  { %v102_v8 = vadd.f32 %v144_v7, %v22_v6 }
  0xcc   :  { %v96_v9 = vpop.f32.mrf.mxu0 }
  0xcd   :  { %v127_v10 = vmul.f32 -1.442695, %v102_v8  ;;  %v97_v11 = vadd.f32 %v96_v9, %v22_v6 }
  0xcf   :  { %145 = vpow2.f32 %v127_v10  ;;  %v126_v12 = vmul.f32 -1.442695, %v97_v11 }
  0xd1   :  { %147 = vpow2.f32 %v126_v12 }
  0xdc   :  { %v146_v13 = vpop.eup %145 }
  0xdd   :  { %v112_v14 = vadd.f32 1.0, %v146_v13 }
  0xde   :  { %v148_v15 = vpop.eup %147 }
  0xdf   :  { %149 = vrcp.f32 %v112_v14  ;;  %v111_v16 = vadd.f32 1.0, %v148_v15 }
  0xe1   :  { %151 = vrcp.f32 %v111_v16 }
  0xec   :  { %v150_v17 = vpop.eup %149 }
  0xed   :  { %119 = vst.msk [vmem:[%s205_s3 + $0x8] sm:$0xff] %vm117_vm1, %v150_v17 }
  0xee   :  { %v152_v18 = vpop.eup %151 }
  0xef   :  { %118 = vst.msk [vmem:[%s205_s3] sm:$0xff] %vm117_vm1, %v152_v18 }

</bundles_post_ra>
